<compile_context>
chip_gen: v7x
topology: tpu7x:2x2x1
jax: 0.10.0
libtpu: 0.0.40
codegen_flags: <defaults>
</compile_context>

<pallas_src>
import math

import jax
import jax.numpy as jnp
from jax.experimental import pallas as pl
from jax.experimental.pallas import tpu as pltpu

H = 250            # hidden width in the torch module
H_PAD = 256        # padded hidden width (lane multiple)
OUT_PAD = 128      # padded output width for a lane-dense store (result = col 0)
EPS = 1e-5

# Packed aux param layout (rows of a (10, H_PAD) f32 array):
#   rows 0..3 : BN gamma for layers 1..4 (padded columns = 0, load-bearing)
#   rows 4..7 : BN beta  for layers 1..4
#   row  8    : output-layer weights wo (length 250, zero-padded)
#   row  9    : output-layer bias bo broadcast across all lanes
AUX_ROWS = 10


def _round_up(x, m):
    return ((x + m - 1) // m) * m


def _bf16_epilogue_default():
    """bf16 VALU epilogue on v6e/v7x (bf16-native VPU), f32 on v5e/older.

    A wrong guess is only a perf issue, never correctness: Mosaic lowers bf16
    elementwise ops on every generation.
    """
    try:
        kind = jax.devices()[0].device_kind.lower()
    except Exception:
        return False
    return not any(old in kind for old in ("v2", "v3", "v4", "v5"))


def _make_kernel(bf16_epilogue):
    def kernel(x_ref, w1_ref, w234_ref, aux_ref, out_ref):
        B = x_ref.shape[0]
        inv_b = 1.0 / B

        def linear_bn_relu(h, w, li):
            # MXU dot with bf16 operands, f32 accumulation.
            z = jnp.dot(h.astype(jnp.bfloat16), w,
                        preferred_element_type=jnp.float32)
            # One-pass batch statistics: two independent cross-sublane
            # reductions (biased variance = torch BN train-mode).
            # TODO(synk): switch to a centered second pass / Welford if the
            # net is ever trained into a |mu| >> sigma regime (cancellation).
            mu = jnp.sum(z, axis=0, keepdims=True) * inv_b
            ex2 = jnp.sum(z * z, axis=0, keepdims=True) * inv_b
            var = jnp.maximum(ex2 - mu * mu, 0.0)
            gamma = aux_ref[li:li + 1, :]          # 0 in padded cols (load-bearing)
            beta = aux_ref[4 + li:5 + li, :]
            scale = gamma * jax.lax.rsqrt(var + EPS)   # folded BN affine
            shift = beta - mu * scale
            if bf16_epilogue:
                # v6e/v7x: VPU is the large-B roofline; run the affine + ReLU
                # in bf16 and hand the next dot its bf16 operand directly.
                z = z.astype(jnp.bfloat16)
                scale = scale.astype(jnp.bfloat16)
                shift = shift.astype(jnp.bfloat16)
            return jnp.maximum(z * scale + shift, 0.0)

        h = linear_bn_relu(x_ref[...], w1_ref[...], 0)
        h = linear_bn_relu(h, w234_ref[0], 1)
        h = linear_bn_relu(h, w234_ref[1], 2)
        h = linear_bn_relu(h, w234_ref[2], 3)

        # Output head: sum_k h[:, k] * wo[k] + bo  (VPU multiply + lane reduce
        # avoids a near-empty MXU push/drain at the tail of the critical path).
        wo_row = aux_ref[8:9, :]                                   # (1, H_PAD)
        val = jnp.sum(h.astype(jnp.float32) * wo_row, axis=-1, keepdims=True)
        out_ref[...] = val + aux_ref[9:10, :OUT_PAD]   # lane-dense (B, 128)

    return kernel


def deep_value_network(x, params, *, bf16_epilogue=None):
    """x: (B, num_states) f32.  params from init_params.  Returns (B, 1) f32."""
    if bf16_epilogue is None:
        bf16_epilogue = _bf16_epilogue_default()
    B, ns = x.shape
    # TODO(synk): masked BN statistics for ragged batches.
    assert B % 8 == 0, "batch must be a multiple of 8 (sublane tile)"

    w1p, w234p, aux = params
    ns_pad = w1p.shape[0]
    if ns != ns_pad:
        x = jnp.pad(x, ((0, 0), (0, ns_pad - ns)))

    args = (x, w1p, w234p, aux)

    def full_spec(shape):
        nd = len(shape)
        return pl.BlockSpec(shape, lambda *_, nd=nd: (0,) * nd)

    flops = 2 * B * H_PAD * (ns_pad + 3 * H_PAD) + 2 * B * H_PAD
    bytes_accessed = (sum(int(a.size) * a.dtype.itemsize for a in args)
                      + B * OUT_PAD * 4)

    out = pl.pallas_call(
        _make_kernel(bf16_epilogue),
        out_shape=jax.ShapeDtypeStruct((B, OUT_PAD), jnp.float32),
        grid=(1,),
        in_specs=[full_spec(a.shape) for a in args],
        out_specs=pl.BlockSpec((B, OUT_PAD), lambda *_: (0, 0)),
        compiler_params=pltpu.CompilerParams(
            dimension_semantics=("arbitrary",),
            vmem_limit_bytes=32 * 1024 * 1024,
        ),
        cost_estimate=pl.CostEstimate(
            flops=flops,
            transcendentals=4 * H_PAD,          # one rsqrt per column per layer
            bytes_accessed=bytes_accessed,
        ),
    )(*args)
    return out[:, :1]


def init_params(key, num_states):
    """Init mirroring the torch module's __init__ distributions.

    Returns (kernel_params, ref_params):
      kernel_params: (w1 bf16 (ns_pad,256), w234 bf16 (3,256,256), aux f32 (10,256))
      ref_params:    unpadded f32 copies for the reference implementations.
    Hidden-layer Linear biases are intentionally not created: training-mode
    BatchNorm subtracts the batch mean, which cancels them exactly.
    """
    keys = jax.random.split(key, 6)

    def kaiming_uniform_w(k, fan_in, fan_out):
        # torch kaiming_uniform_(nonlinearity='relu'): bound = sqrt(6 / fan_in)
        bound = math.sqrt(6.0 / fan_in)
        # stored as (in, out) -- already the transpose of torch's (out, in)
        return jax.random.uniform(k, (fan_in, fan_out), jnp.float32,
                                  -bound, bound)

    w1 = kaiming_uniform_w(keys[0], num_states, H)
    w2 = kaiming_uniform_w(keys[1], H, H)
    w3 = kaiming_uniform_w(keys[2], H, H)
    w4 = kaiming_uniform_w(keys[3], H, H)
    wo = jax.random.uniform(keys[4], (H,), jnp.float32, -0.003, 0.003)
    bo = jax.random.uniform(keys[5], (), jnp.float32, -0.003, 0.003)

    ns_pad = _round_up(max(num_states, 1), 128)

    def pad_w(w, rows, cols):
        full = jnp.zeros((rows, cols), jnp.float32)
        return full.at[:w.shape[0], :w.shape[1]].set(w)

    w1p = pad_w(w1, ns_pad, H_PAD).astype(jnp.bfloat16)
    w234p = jnp.stack([pad_w(w, H_PAD, H_PAD) for w in (w2, w3, w4)],
                      axis=0).astype(jnp.bfloat16)

    aux = jnp.zeros((AUX_ROWS, H_PAD), jnp.float32)
    aux = aux.at[0:4, :H].set(1.0)      # gammas (BatchNorm1d default weight);
                                        # padded cols stay 0 -> kill padding
    # betas (rows 4..7) stay 0 (BatchNorm1d default bias)
    aux = aux.at[8, :H].set(wo)         # output weights (f32)
    aux = aux.at[9, :].set(bo)          # output bias broadcast over lanes

    kernel_params = (w1p, w234p, aux)
    ref_params = dict(w1=w1, w2=w2, w3=w3, w4=w4, wo=wo, bo=bo)
    return kernel_params, ref_params


def _reference_exact(x, ref_params, bf16_epilogue):
    """Plain-JAX mirror of the kernel math (bf16 dot operands, one-pass BN,
    folded affine, optional bf16 epilogue, no hidden biases)."""
    B = x.shape[0]
    h = x
    for name in ("w1", "w2", "w3", "w4"):
        w = ref_params[name].astype(jnp.bfloat16)
        z = jnp.dot(h.astype(jnp.bfloat16), w,
                    preferred_element_type=jnp.float32)
        mu = jnp.sum(z, axis=0, keepdims=True) / B
        var = jnp.maximum(jnp.sum(z * z, axis=0, keepdims=True) / B - mu * mu,
                          0.0)
        scale = jax.lax.rsqrt(var + EPS)          # gamma = 1
        shift = -mu * scale                       # beta = 0
        if bf16_epilogue:
            z = z.astype(jnp.bfloat16)
            scale = scale.astype(jnp.bfloat16)
            shift = shift.astype(jnp.bfloat16)
        h = jnp.maximum(z * scale + shift, 0.0)
    return (jnp.sum(h.astype(jnp.float32) * ref_params["wo"][None, :],
                    axis=-1, keepdims=True) + ref_params["bo"])


def _reference_torch(x, ref_params):
    """Torch-semantics f32 reference (training-mode BN, biased variance).
    Hidden Linear biases omitted because BN's batch-mean subtraction cancels
    them exactly; gamma=1, beta=0 as in a fresh BatchNorm1d."""
    h = x
    for name in ("w1", "w2", "w3", "w4"):
        z = h @ ref_params[name]
        mu = jnp.mean(z, axis=0, keepdims=True)
        var = jnp.mean((z - mu) ** 2, axis=0, keepdims=True)
        h = jnp.maximum((z - mu) * jax.lax.rsqrt(var + EPS), 0.0)
    return h @ ref_params["wo"][:, None] + ref_params["bo"]


if __name__ == "__main__":
    B = 8              # small demo shape; throughput scales ~free up to the
    NUM_STATES = 32    # MXU row count (128 v5e / 256 v6e,v7x) per perf review
    key = jax.random.PRNGKey(0)
    k_x, k_p = jax.random.split(key)

    x = jax.random.normal(k_x, (B, NUM_STATES), jnp.float32)
    kernel_params, ref_params = init_params(k_p, NUM_STATES)

    bf16_epi = _bf16_epilogue_default()
    out = deep_value_network(x, kernel_params, bf16_epilogue=bf16_epi)
    jax.block_until_ready(out)
    assert out.shape == (B, 1), out.shape

    # Tight check against a reference that mirrors the kernel math exactly.
    ref_e = _reference_exact(x, ref_params, bf16_epi)
    err_e = float(jnp.max(jnp.abs(out - ref_e)))
    tol_e = 2e-3 if bf16_epi else 1e-4
    assert err_e <= tol_e, ("exact-ref mismatch", err_e, out, ref_e)

    # Looser check against full-f32 torch-style math (bf16 weight/activation
    # quantization is the only difference; output magnitude ~0.03).
    ref_t = _reference_torch(x, ref_params)
    err_t = float(jnp.max(jnp.abs(out - ref_t)))
    assert err_t <= 8e-3, ("torch-ref mismatch", err_t, out, ref_t)

    print("KERNEL_OK")
</pallas_src>

<mosaic_0001>
module attributes {stable_mosaic.version = 11 : i64} {
  func.func @kernel(%arg0: i32, %arg1: memref<8x128xf32, #tpu.memory_space<vmem>>, %arg2: memref<128x256xbf16, #tpu.memory_space<vmem>>, %arg3: memref<3x256x256xbf16, #tpu.memory_space<vmem>>, %arg4: memref<10x256xf32, #tpu.memory_space<vmem>>, %arg5: memref<8x128xf32, #tpu.memory_space<vmem>>) attributes {dimension_semantics = [#tpu.dimension_semantics<arbitrary>], iteration_bounds = array<i64: 1>, scalar_prefetch = 0 : i64, scratch_operands = 0 : i64, tpu.core_type = #tpu.core_type<tc>, window_params = [{pipeline_mode = #tpu.pipeline_mode<synchronous>, transform_indices = @transform_0, window_bounds = array<i64: 8, 128>}, {pipeline_mode = #tpu.pipeline_mode<synchronous>, transform_indices = @transform_1, window_bounds = array<i64: 128, 256>}, {pipeline_mode = #tpu.pipeline_mode<synchronous>, transform_indices = @transform_2, window_bounds = array<i64: 3, 256, 256>}, {pipeline_mode = #tpu.pipeline_mode<synchronous>, transform_indices = @transform_3, window_bounds = array<i64: 10, 256>}, {pipeline_mode = #tpu.pipeline_mode<synchronous>, transform_indices = @transform_4, window_bounds = array<i64: 8, 128>}]} {
    %c0 = arith.constant 0 : index
    %c0_0 = arith.constant 0 : index
    %0 = vector.load %arg1[%c0, %c0_0] : memref<8x128xf32, #tpu.memory_space<vmem>>, vector<8x128xf32>
    %c0_1 = arith.constant 0 : index
    %c0_2 = arith.constant 0 : index
    %1 = vector.load %arg2[%c0_1, %c0_2] : memref<128x256xbf16, #tpu.memory_space<vmem>>, vector<128x256xbf16>
    %2 = arith.truncf %0 : vector<8x128xf32> to vector<8x128xbf16>
    %cst = arith.constant dense<0.000000e+00> : vector<8x256xf32>
    %3 = tpu.matmul %2, %1, %cst {dimension_numbers = #tpu.dot_dimension_numbers<[1], [0], [0], [1], [0, 0, 1, 1], [], []>} : vector<8x128xbf16>, vector<128x256xbf16>, vector<8x256xf32> -> vector<8x256xf32>
    %cst_3 = arith.constant dense<0.000000e+00> : vector<256xf32>
    %4 = vector.multi_reduction <add>, %3, %cst_3 [0] : vector<8x256xf32> to vector<256xf32>
    %5 = vector.shape_cast %4 : vector<256xf32> to vector<1x256xf32>
    %cst_4 = arith.constant 1.250000e-01 : f32
    %6 = vector.broadcast %cst_4 : f32 to vector<1x256xf32>
    %7 = arith.mulf %5, %6 : vector<1x256xf32>
    %8 = arith.mulf %3, %3 : vector<8x256xf32>
    %cst_5 = arith.constant dense<0.000000e+00> : vector<256xf32>
    %9 = vector.multi_reduction <add>, %8, %cst_5 [0] : vector<8x256xf32> to vector<256xf32>
    %10 = vector.shape_cast %9 : vector<256xf32> to vector<1x256xf32>
    %cst_6 = arith.constant 1.250000e-01 : f32
    %11 = vector.broadcast %cst_6 : f32 to vector<1x256xf32>
    %12 = arith.mulf %10, %11 : vector<1x256xf32>
    %13 = arith.mulf %7, %7 : vector<1x256xf32>
    %14 = arith.subf %12, %13 : vector<1x256xf32>
    %cst_7 = arith.constant 0.000000e+00 : f32
    %15 = vector.broadcast %cst_7 : f32 to vector<1x256xf32>
    %16 = arith.maximumf %14, %15 : vector<1x256xf32>
    %c0_8 = arith.constant 0 : index
    %c0_9 = arith.constant 0 : index
    %17 = vector.load %arg4[%c0_8, %c0_9] : memref<10x256xf32, #tpu.memory_space<vmem>>, vector<1x256xf32>
    %c4 = arith.constant 4 : index
    %c0_10 = arith.constant 0 : index
    %18 = vector.load %arg4[%c4, %c0_10] : memref<10x256xf32, #tpu.memory_space<vmem>>, vector<1x256xf32>
    %cst_11 = arith.constant 9.99999974E-6 : f32
    %19 = vector.broadcast %cst_11 : f32 to vector<1x256xf32>
    %20 = arith.addf %16, %19 : vector<1x256xf32>
    %21 = math.rsqrt %20 : vector<1x256xf32>
    %22 = arith.mulf %17, %21 : vector<1x256xf32>
    %23 = arith.mulf %7, %22 : vector<1x256xf32>
    %24 = arith.subf %18, %23 : vector<1x256xf32>
    %25 = arith.truncf %3 : vector<8x256xf32> to vector<8x256xbf16>
    %26 = arith.truncf %22 : vector<1x256xf32> to vector<1x256xbf16>
    %27 = arith.truncf %24 : vector<1x256xf32> to vector<1x256xbf16>
    %28 = vector.broadcast %26 : vector<1x256xbf16> to vector<8x256xbf16>
    %29 = arith.mulf %25, %28 : vector<8x256xbf16>
    %30 = vector.broadcast %27 : vector<1x256xbf16> to vector<8x256xbf16>
    %31 = arith.addf %29, %30 : vector<8x256xbf16>
    %cst_12 = arith.constant 0.000000e+00 : bf16
    %32 = vector.broadcast %cst_12 : bf16 to vector<8x256xbf16>
    %33 = arith.maximumf %31, %32 : vector<8x256xbf16>
    %c0_13 = arith.constant 0 : index
    %c0_14 = arith.constant 0 : index
    %c0_15 = arith.constant 0 : index
    %34 = vector.load %arg3[%c0_13, %c0_14, %c0_15] : memref<3x256x256xbf16, #tpu.memory_space<vmem>>, vector<1x256x256xbf16>
    %35 = vector.shape_cast %34 : vector<1x256x256xbf16> to vector<256x256xbf16>
    %cst_16 = arith.constant dense<0.000000e+00> : vector<8x256xf32>
    %36 = tpu.matmul %33, %35, %cst_16 {dimension_numbers = #tpu.dot_dimension_numbers<[1], [0], [0], [1], [0, 0, 1, 1], [], []>} : vector<8x256xbf16>, vector<256x256xbf16>, vector<8x256xf32> -> vector<8x256xf32>
    %cst_17 = arith.constant dense<0.000000e+00> : vector<256xf32>
    %37 = vector.multi_reduction <add>, %36, %cst_17 [0] : vector<8x256xf32> to vector<256xf32>
    %38 = vector.shape_cast %37 : vector<256xf32> to vector<1x256xf32>
    %cst_18 = arith.constant 1.250000e-01 : f32
    %39 = vector.broadcast %cst_18 : f32 to vector<1x256xf32>
    %40 = arith.mulf %38, %39 : vector<1x256xf32>
    %41 = arith.mulf %36, %36 : vector<8x256xf32>
    %cst_19 = arith.constant dense<0.000000e+00> : vector<256xf32>
    %42 = vector.multi_reduction <add>, %41, %cst_19 [0] : vector<8x256xf32> to vector<256xf32>
    %43 = vector.shape_cast %42 : vector<256xf32> to vector<1x256xf32>
    %cst_20 = arith.constant 1.250000e-01 : f32
    %44 = vector.broadcast %cst_20 : f32 to vector<1x256xf32>
    %45 = arith.mulf %43, %44 : vector<1x256xf32>
    %46 = arith.mulf %40, %40 : vector<1x256xf32>
    %47 = arith.subf %45, %46 : vector<1x256xf32>
    %cst_21 = arith.constant 0.000000e+00 : f32
    %48 = vector.broadcast %cst_21 : f32 to vector<1x256xf32>
    %49 = arith.maximumf %47, %48 : vector<1x256xf32>
    %c1 = arith.constant 1 : index
    %c0_22 = arith.constant 0 : index
    %50 = vector.load %arg4[%c1, %c0_22] : memref<10x256xf32, #tpu.memory_space<vmem>>, vector<1x256xf32>
    %c5 = arith.constant 5 : index
    %c0_23 = arith.constant 0 : index
    %51 = vector.load %arg4[%c5, %c0_23] : memref<10x256xf32, #tpu.memory_space<vmem>>, vector<1x256xf32>
    %cst_24 = arith.constant 9.99999974E-6 : f32
    %52 = vector.broadcast %cst_24 : f32 to vector<1x256xf32>
    %53 = arith.addf %49, %52 : vector<1x256xf32>
    %54 = math.rsqrt %53 : vector<1x256xf32>
    %55 = arith.mulf %50, %54 : vector<1x256xf32>
    %56 = arith.mulf %40, %55 : vector<1x256xf32>
    %57 = arith.subf %51, %56 : vector<1x256xf32>
    %58 = arith.truncf %36 : vector<8x256xf32> to vector<8x256xbf16>
    %59 = arith.truncf %55 : vector<1x256xf32> to vector<1x256xbf16>
    %60 = arith.truncf %57 : vector<1x256xf32> to vector<1x256xbf16>
    %61 = vector.broadcast %59 : vector<1x256xbf16> to vector<8x256xbf16>
    %62 = arith.mulf %58, %61 : vector<8x256xbf16>
    %63 = vector.broadcast %60 : vector<1x256xbf16> to vector<8x256xbf16>
    %64 = arith.addf %62, %63 : vector<8x256xbf16>
    %cst_25 = arith.constant 0.000000e+00 : bf16
    %65 = vector.broadcast %cst_25 : bf16 to vector<8x256xbf16>
    %66 = arith.maximumf %64, %65 : vector<8x256xbf16>
    %c1_26 = arith.constant 1 : index
    %c0_27 = arith.constant 0 : index
    %c0_28 = arith.constant 0 : index
    %67 = vector.load %arg3[%c1_26, %c0_27, %c0_28] : memref<3x256x256xbf16, #tpu.memory_space<vmem>>, vector<1x256x256xbf16>
    %68 = vector.shape_cast %67 : vector<1x256x256xbf16> to vector<256x256xbf16>
    %cst_29 = arith.constant dense<0.000000e+00> : vector<8x256xf32>
    %69 = tpu.matmul %66, %68, %cst_29 {dimension_numbers = #tpu.dot_dimension_numbers<[1], [0], [0], [1], [0, 0, 1, 1], [], []>} : vector<8x256xbf16>, vector<256x256xbf16>, vector<8x256xf32> -> vector<8x256xf32>
    %cst_30 = arith.constant dense<0.000000e+00> : vector<256xf32>
    %70 = vector.multi_reduction <add>, %69, %cst_30 [0] : vector<8x256xf32> to vector<256xf32>
    %71 = vector.shape_cast %70 : vector<256xf32> to vector<1x256xf32>
    %cst_31 = arith.constant 1.250000e-01 : f32
    %72 = vector.broadcast %cst_31 : f32 to vector<1x256xf32>
    %73 = arith.mulf %71, %72 : vector<1x256xf32>
    %74 = arith.mulf %69, %69 : vector<8x256xf32>
    %cst_32 = arith.constant dense<0.000000e+00> : vector<256xf32>
    %75 = vector.multi_reduction <add>, %74, %cst_32 [0] : vector<8x256xf32> to vector<256xf32>
    %76 = vector.shape_cast %75 : vector<256xf32> to vector<1x256xf32>
    %cst_33 = arith.constant 1.250000e-01 : f32
    %77 = vector.broadcast %cst_33 : f32 to vector<1x256xf32>
    %78 = arith.mulf %76, %77 : vector<1x256xf32>
    %79 = arith.mulf %73, %73 : vector<1x256xf32>
    %80 = arith.subf %78, %79 : vector<1x256xf32>
    %cst_34 = arith.constant 0.000000e+00 : f32
    %81 = vector.broadcast %cst_34 : f32 to vector<1x256xf32>
    %82 = arith.maximumf %80, %81 : vector<1x256xf32>
    %c2 = arith.constant 2 : index
    %c0_35 = arith.constant 0 : index
    %83 = vector.load %arg4[%c2, %c0_35] : memref<10x256xf32, #tpu.memory_space<vmem>>, vector<1x256xf32>
    %c6 = arith.constant 6 : index
    %c0_36 = arith.constant 0 : index
    %84 = vector.load %arg4[%c6, %c0_36] : memref<10x256xf32, #tpu.memory_space<vmem>>, vector<1x256xf32>
    %cst_37 = arith.constant 9.99999974E-6 : f32
    %85 = vector.broadcast %cst_37 : f32 to vector<1x256xf32>
    %86 = arith.addf %82, %85 : vector<1x256xf32>
    %87 = math.rsqrt %86 : vector<1x256xf32>
    %88 = arith.mulf %83, %87 : vector<1x256xf32>
    %89 = arith.mulf %73, %88 : vector<1x256xf32>
    %90 = arith.subf %84, %89 : vector<1x256xf32>
    %91 = arith.truncf %69 : vector<8x256xf32> to vector<8x256xbf16>
    %92 = arith.truncf %88 : vector<1x256xf32> to vector<1x256xbf16>
    %93 = arith.truncf %90 : vector<1x256xf32> to vector<1x256xbf16>
    %94 = vector.broadcast %92 : vector<1x256xbf16> to vector<8x256xbf16>
    %95 = arith.mulf %91, %94 : vector<8x256xbf16>
    %96 = vector.broadcast %93 : vector<1x256xbf16> to vector<8x256xbf16>
    %97 = arith.addf %95, %96 : vector<8x256xbf16>
    %cst_38 = arith.constant 0.000000e+00 : bf16
    %98 = vector.broadcast %cst_38 : bf16 to vector<8x256xbf16>
    %99 = arith.maximumf %97, %98 : vector<8x256xbf16>
    %c2_39 = arith.constant 2 : index
    %c0_40 = arith.constant 0 : index
    %c0_41 = arith.constant 0 : index
    %100 = vector.load %arg3[%c2_39, %c0_40, %c0_41] : memref<3x256x256xbf16, #tpu.memory_space<vmem>>, vector<1x256x256xbf16>
    %101 = vector.shape_cast %100 : vector<1x256x256xbf16> to vector<256x256xbf16>
    %cst_42 = arith.constant dense<0.000000e+00> : vector<8x256xf32>
    %102 = tpu.matmul %99, %101, %cst_42 {dimension_numbers = #tpu.dot_dimension_numbers<[1], [0], [0], [1], [0, 0, 1, 1], [], []>} : vector<8x256xbf16>, vector<256x256xbf16>, vector<8x256xf32> -> vector<8x256xf32>
    %cst_43 = arith.constant dense<0.000000e+00> : vector<256xf32>
    %103 = vector.multi_reduction <add>, %102, %cst_43 [0] : vector<8x256xf32> to vector<256xf32>
    %104 = vector.shape_cast %103 : vector<256xf32> to vector<1x256xf32>
    %cst_44 = arith.constant 1.250000e-01 : f32
    %105 = vector.broadcast %cst_44 : f32 to vector<1x256xf32>
    %106 = arith.mulf %104, %105 : vector<1x256xf32>
    %107 = arith.mulf %102, %102 : vector<8x256xf32>
    %cst_45 = arith.constant dense<0.000000e+00> : vector<256xf32>
    %108 = vector.multi_reduction <add>, %107, %cst_45 [0] : vector<8x256xf32> to vector<256xf32>
    %109 = vector.shape_cast %108 : vector<256xf32> to vector<1x256xf32>
    %cst_46 = arith.constant 1.250000e-01 : f32
    %110 = vector.broadcast %cst_46 : f32 to vector<1x256xf32>
    %111 = arith.mulf %109, %110 : vector<1x256xf32>
    %112 = arith.mulf %106, %106 : vector<1x256xf32>
    %113 = arith.subf %111, %112 : vector<1x256xf32>
    %cst_47 = arith.constant 0.000000e+00 : f32
    %114 = vector.broadcast %cst_47 : f32 to vector<1x256xf32>
    %115 = arith.maximumf %113, %114 : vector<1x256xf32>
    %c3 = arith.constant 3 : index
    %c0_48 = arith.constant 0 : index
    %116 = vector.load %arg4[%c3, %c0_48] : memref<10x256xf32, #tpu.memory_space<vmem>>, vector<1x256xf32>
    %c7 = arith.constant 7 : index
    %c0_49 = arith.constant 0 : index
    %117 = vector.load %arg4[%c7, %c0_49] : memref<10x256xf32, #tpu.memory_space<vmem>>, vector<1x256xf32>
    %cst_50 = arith.constant 9.99999974E-6 : f32
    %118 = vector.broadcast %cst_50 : f32 to vector<1x256xf32>
    %119 = arith.addf %115, %118 : vector<1x256xf32>
    %120 = math.rsqrt %119 : vector<1x256xf32>
    %121 = arith.mulf %116, %120 : vector<1x256xf32>
    %122 = arith.mulf %106, %121 : vector<1x256xf32>
    %123 = arith.subf %117, %122 : vector<1x256xf32>
    %124 = arith.truncf %102 : vector<8x256xf32> to vector<8x256xbf16>
    %125 = arith.truncf %121 : vector<1x256xf32> to vector<1x256xbf16>
    %126 = arith.truncf %123 : vector<1x256xf32> to vector<1x256xbf16>
    %127 = vector.broadcast %125 : vector<1x256xbf16> to vector<8x256xbf16>
    %128 = arith.mulf %124, %127 : vector<8x256xbf16>
    %129 = vector.broadcast %126 : vector<1x256xbf16> to vector<8x256xbf16>
    %130 = arith.addf %128, %129 : vector<8x256xbf16>
    %cst_51 = arith.constant 0.000000e+00 : bf16
    %131 = vector.broadcast %cst_51 : bf16 to vector<8x256xbf16>
    %132 = arith.maximumf %130, %131 : vector<8x256xbf16>
    %c8 = arith.constant 8 : index
    %c0_52 = arith.constant 0 : index
    %133 = vector.load %arg4[%c8, %c0_52] : memref<10x256xf32, #tpu.memory_space<vmem>>, vector<1x256xf32>
    %134 = arith.extf %132 : vector<8x256xbf16> to vector<8x256xf32>
    %135 = vector.broadcast %133 : vector<1x256xf32> to vector<8x256xf32>
    %136 = arith.mulf %134, %135 : vector<8x256xf32>
    %cst_53 = arith.constant dense<0.000000e+00> : vector<8xf32>
    %137 = vector.multi_reduction <add>, %136, %cst_53 [1] : vector<8x256xf32> to vector<8xf32>
    %138 = vector.shape_cast %137 : vector<8xf32> to vector<8x1xf32>
    %c9 = arith.constant 9 : index
    %c0_54 = arith.constant 0 : index
    %139 = vector.load %arg4[%c9, %c0_54] : memref<10x256xf32, #tpu.memory_space<vmem>>, vector<1x128xf32>
    %140 = vector.broadcast %138 : vector<8x1xf32> to vector<8x128xf32>
    %141 = vector.broadcast %139 : vector<1x128xf32> to vector<8x128xf32>
    %142 = arith.addf %140, %141 : vector<8x128xf32>
    %c0_55 = arith.constant 0 : index
    %c0_56 = arith.constant 0 : index
    %143 = vector.load %arg5[%c0_55, %c0_56] : memref<8x128xf32, #tpu.memory_space<vmem>>, vector<8x128xf32>
    tpu.vector_store %arg5[%c0_55, %c0_56], %142 {strides = array<i32>} : memref<8x128xf32, #tpu.memory_space<vmem>>, vector<8x128xf32>,
    return
  }
  func.func @transform_0(%arg0: i32) -> (i32, i32) {
    %c0_i32 = arith.constant 0 : i32
    %c0_i32_0 = arith.constant 0 : i32
    %c0_i32_1 = arith.constant 0 : i32
    return %c0_i32, %c0_i32_0 : i32, i32
  }
  func.func @transform_1(%arg0: i32) -> (i32, i32) {
    %c0_i32 = arith.constant 0 : i32
    %c0_i32_0 = arith.constant 0 : i32
    %c0_i32_1 = arith.constant 0 : i32
    return %c0_i32, %c0_i32_0 : i32, i32
  }
  func.func @transform_2(%arg0: i32) -> (i32, i32, i32) {
    %c0_i32 = arith.constant 0 : i32
    %c0_i32_0 = arith.constant 0 : i32
    %c0_i32_1 = arith.constant 0 : i32
    %c0_i32_2 = arith.constant 0 : i32
    return %c0_i32, %c0_i32_0, %c0_i32_1 : i32, i32, i32
  }
  func.func @transform_3(%arg0: i32) -> (i32, i32) {
    %c0_i32 = arith.constant 0 : i32
    %c0_i32_0 = arith.constant 0 : i32
    %c0_i32_1 = arith.constant 0 : i32
    return %c0_i32, %c0_i32_0 : i32, i32
  }
  func.func @transform_4(%arg0: i32) -> (i32, i32) {
    %c0_i32 = arith.constant 0 : i32
    %c0_i32_0 = arith.constant 0 : i32
    %c0_i32_1 = arith.constant 0 : i32
    return %c0_i32, %c0_i32_0 : i32, i32
  }
}

</mosaic_0001>

<bundles_post_ra>
// kernel: tpu_custom_call.1
= control target key start
LH: loop header
LB: loop body
LE: loop exit
PB: predicated region body
PF: predicated region fallthrough
CT: control target
= control target key end

     0   :  { %9 = vsyncpa [#allocation3], 0  ;;  %s2191_s0 = inlined_call_operand.hbm [shape: f32[8,128], index: 0, kind: input, shape index: {}]   ;;  %s2192_s1 = inlined_call_operand.hbm [shape: bf16[128,256], index: 1, kind: input, shape index: {}]   ;;  %s2193_s2 = inlined_call_operand.hbm [shape: bf16[3,256,256], index: 2, kind: input, shape index: {}]   ;;  %s2194_s3 = inlined_call_operand.hbm [shape: f32[10,256], index: 3, kind: input, shape index: {}]   ;;  %s2195_s4 = inlined_call_operand.hbm [shape: f32[8,128], index: 4, kind: output, shape index: {}]  }
   0x1   :  { %10 = vsyncpa [#allocation6], 0 }
   0x2   :  { %11 = vsyncpa [#allocation9], 0 }
   0x3   :  { %12 = vsyncpa [#allocation4], 0  ;;  %s1960_s15 = smov [#allocation5]   ;;  %s1842_s19 = scalar_lea.hbm %s2192_s1, 2048 }
   0x4   :  { %s28_s16 = sshll.u32 %s1960_s15, 4  ;;  %p1843_p0 = scmp.ne.s32.totalorder %s2192_s1, %s1842_s19  ;;  %s29_s16 = int_to_ptr.vmem [resolvable:$true] %s28_s16 }
   0x5   :  { %p1846_p1 = scmp.lt.u32.totalorder %s1842_s19, %s2192_s1 }
   0x7   :  { %p1848_p2 = pnand %p1846_p1, %p1843_p0 }
   0x9   :  { %1851 = shalt.err (!%p1848_p2)
}
   0xa   :  { %s1852_s24 = scalar_lea.vmem %s29_s16, 2048  ;;  %p1857_p4 = scmp.lt.s32.totalorder %s29_s16, %s29_s16 }
   0xb   :  { %p1853_p3 = scmp.ne.s32.totalorder %s29_s16, %s1852_s24  ;;  %p1858_p5 = scmp.lt.s32.totalorder %s1852_s24, %s1852_s24 }
   0xd   :  { %p1859_p6 = por %p1858_p5, %p1857_p4 }
   0xf   :  { %p1860_p7 = pnand %p1859_p6, %p1853_p3 }
  0x11   :  { %1863 = shalt.err (!%p1860_p7)
}
  0x12   :  { %s1961_s25 = smov 128   ;;  %s1962_s26 = smov 8  }
  0x13   :  { %34 = dma.hbm_to_vmem [thread:$0]  %s2192_s1, 2048, %s29_s16, [#allocation6], %s1961_s25, %s1961_s25, %s1962_s26  }
  0x14   :  { %s1963_s29 = smov [#allocation2]   ;;  %s1964_s5 = smov [#allocation7]  }
  0x15   :  { %s19_s30 = sshll.u32 %s1963_s29, 4  ;;  %s40_s6 = sshll.u32 %s1964_s5, 4  ;;  %s20_s30 = int_to_ptr.vmem [resolvable:$true] %s19_s30  ;;  %s41_s6 = int_to_ptr.vmem [resolvable:$true] %s40_s6 }
  0x16   :  { %s1864_s9 = scalar_lea.hbm %s2191_s0, 128 }
  0x17   :  { %p1865_p8 = scmp.ne.s32.totalorder %s2191_s0, %s1864_s9  ;;  %p1868_p9 = scmp.lt.u32.totalorder %s1864_s9, %s2191_s0 }
  0x19   :  { %p1870_p10 = pnand %p1868_p9, %p1865_p8 }
  0x1b   :  { %1873 = shalt.err (!%p1870_p10)
}
  0x1c   :  { %s1874_s1 = scalar_lea.vmem %s20_s30, 128  ;;  %p1879_p12 = scmp.lt.s32.totalorder %s20_s30, %s20_s30 }
  0x1d   :  { %p1875_p11 = scmp.ne.s32.totalorder %s20_s30, %s1874_s1  ;;  %p1880_p13 = scmp.lt.s32.totalorder %s1874_s1, %s1874_s1 }
  0x1f   :  { %p1881_p0 = por %p1880_p13, %p1879_p12 }
  0x21   :  { %p1882_p1 = pnand %p1881_p0, %p1875_p11 }
  0x23   :  { %1885 = shalt.err (!%p1882_p1)
}
  0x24   :  { %22 = dma.hbm_to_vmem [thread:$0]  %s2191_s0, 128, %s20_s30, [#allocation3]  }
  0x25   :  { %s1886_s18 = scalar_lea.hbm %s2193_s2, 12288 }
  0x26   :  { %p1887_p2 = scmp.ne.s32.totalorder %s2193_s2, %s1886_s18  ;;  %p1890_p3 = scmp.lt.u32.totalorder %s1886_s18, %s2193_s2 }
  0x28   :  { %p1892_p4 = pnand %p1890_p3, %p1887_p2 }
  0x2a   :  { %1895 = shalt.err (!%p1892_p4)
}
  0x2b   :  { %s1896_s23 = scalar_lea.vmem %s41_s6, 12288  ;;  %p1901_p6 = scmp.lt.s32.totalorder %s41_s6, %s41_s6 }
  0x2c   :  { %p1897_p5 = scmp.ne.s32.totalorder %s41_s6, %s1896_s23  ;;  %p1902_p7 = scmp.lt.s32.totalorder %s1896_s23, %s1896_s23 }
  0x2e   :  { %p1903_p8 = por %p1902_p7, %p1901_p6 }
  0x30   :  { %p1904_p9 = pnand %p1903_p8, %p1897_p5 }
  0x32   :  { %1907 = shalt.err (!%p1904_p9)
}
  0x33   :  { %46 = dma.hbm_to_vmem [thread:$0]  %s2193_s2, 12288, %s41_s6, [#allocation6], %s1961_s25, %s1961_s25, %s1962_s26  }
  0x34   :  { %s1965_s27 = smov [#allocation8]   ;;  %s1908_s5 = scalar_lea.hbm %s2194_s3, 512 }
  0x35   :  { %s52_s28 = sshll.u32 %s1965_s27, 4  ;;  %p1909_p10 = scmp.ne.s32.totalorder %s2194_s3, %s1908_s5  ;;  %s53_s28 = int_to_ptr.vmem [resolvable:$true] %s52_s28 }
  0x36   :  { %p1912_p11 = scmp.lt.u32.totalorder %s1908_s5, %s2194_s3 }
  0x38   :  { %p1914_p12 = pnand %p1912_p11, %p1909_p10 }
  0x3a   :  { %1917 = shalt.err (!%p1914_p12)
}
  0x3b   :  { %s1918_s11 = scalar_lea.vmem %s53_s28, 512  ;;  %p1923_p0 = scmp.lt.s32.totalorder %s53_s28, %s53_s28 }
  0x3c   :  { %p1919_p13 = scmp.ne.s32.totalorder %s53_s28, %s1918_s11  ;;  %p1924_p1 = scmp.lt.s32.totalorder %s1918_s11, %s1918_s11 }
  0x3e   :  { %p1925_p2 = por %p1924_p1, %p1923_p0 }
  0x40   :  { %p1926_p3 = pnand %p1925_p2, %p1919_p13 }
  0x42   :  { %1929 = shalt.err (!%p1926_p3)
}
  0x43   :  { %s1966_s2 = smov 256   ;;  %s1967_s25 = smov 16  }
  0x44   :  { %58 = dma.hbm_to_vmem [thread:$0]  %s2194_s3, 512, %s53_s28, [#allocation9], %s1966_s2, %s1966_s2, %s1967_s25  }
  0x45   :  { %1952 = dma.done.wait [#allocation3], 128  }
  0x46   :  { %1953 = vsyncadd [#allocation3], 4294967168 }
  0x47   :  { %1954 = dma.done.wait [#allocation6], 14336  }
  0x48   :  { %1955 = vsyncadd [#allocation6], 4294952960 }
  0x49   :  { %1956 = dma.done.wait [#allocation9], 512  }
  0x4a   :  { %1957 = vsyncadd [#allocation9], 4294966784  ;;  %v1968_v0 = vmov 0   ;;  %v1658_v1 = vld [vmem:[#allocation5 + $0x4] ss:$8 sps:$4 sm:$0xff]   ;;  %v72_v17 = vld [vmem:[#allocation2] sm:$0xff] }
  0x4b   :  { %202 = vmatprep.mubr.bf16.mxu0 %v1968_v0  ;;  %v1660_v2 = vld [vmem:[#allocation5] ss:$8 sps:$4 sm:$0xff]   ;;  %170 = vmatprep.subr.bf16.mxu0 %v1658_v1  ;;  %v1661_v3 = vld [vmem:[#allocation5 + $0x14] ss:$8 sps:$4 sm:$0xff]   ;;  %v1663_v4 = vld [vmem:[#allocation5 + $0x10] ss:$8 sps:$4 sm:$0xff]   ;;  %v89_v18 = vpack.c.bf16 %v72_v17, %v72_v17 }
  0x4c   :  { %171 = vmatpush1.bf16.msra.mxu0 %v1660_v2  ;;  %v1664_v5 = vld [vmem:[#allocation5 + $0x24] ss:$8 sps:$4 sm:$0xff]   ;;  %v1666_v6 = vld [vmem:[#allocation5 + $0x20] ss:$8 sps:$4 sm:$0xff]   ;;  %v1667_v7 = vld [vmem:[#allocation5 + $0x34] ss:$8 sps:$4 sm:$0xff]  }
  0x4d   :  { %172 = vmatprep.subr.bf16.mxu0 %v1661_v3  ;;  %v1669_v8 = vld [vmem:[#allocation5 + $0x30] ss:$8 sps:$4 sm:$0xff]   ;;  %v1670_v9 = vld [vmem:[#allocation5 + $0x44] ss:$8 sps:$4 sm:$0xff]   ;;  %v1672_v10 = vld [vmem:[#allocation5 + $0x40] ss:$8 sps:$4 sm:$0xff]  }
  0x4e   :  { %v1673_v11 = vld [vmem:[#allocation5 + $0x54] ss:$8 sps:$4 sm:$0xff]   ;;  %v1675_v12 = vld [vmem:[#allocation5 + $0x50] ss:$8 sps:$4 sm:$0xff]   ;;  %v1676_v13 = vld [vmem:[#allocation5 + $0x64] ss:$8 sps:$4 sm:$0xff]  }
  0x4f   :  { %v1678_v14 = vld [vmem:[#allocation5 + $0x60] ss:$8 sps:$4 sm:$0xff]   ;;  %v1679_v15 = vld [vmem:[#allocation5 + $0x74] ss:$8 sps:$4 sm:$0xff]   ;;  %v1681_v16 = vld [vmem:[#allocation5 + $0x70] ss:$8 sps:$4 sm:$0xff]  }
  0x50   :  { %173 = vmatpush1.bf16.msra.mxu0 %v1663_v4  ;;  %v1682_v19 = vld [vmem:[#allocation7 + $0x4] ss:$8 sps:$4 sm:$0xff]   ;;  %v1684_v20 = vld [vmem:[#allocation7] ss:$8 sps:$4 sm:$0xff]   ;;  %v1685_v21 = vld [vmem:[#allocation7 + $0x14] ss:$8 sps:$4 sm:$0xff]  }
  0x51   :  { %174 = vmatprep.subr.bf16.mxu0 %v1664_v5  ;;  %548 = vmatprep.subr.bf16.mxu1 %v1682_v19  ;;  %v1687_v22 = vld [vmem:[#allocation7 + $0x10] ss:$8 sps:$4 sm:$0xff]   ;;  %v1688_v23 = vld [vmem:[#allocation7 + $0x24] ss:$8 sps:$4 sm:$0xff]   ;;  %v1690_v24 = vld [vmem:[#allocation7 + $0x20] ss:$8 sps:$4 sm:$0xff]  }
  0x52   :  { %549 = vmatpush1.bf16.msra.mxu1 %v1684_v20  ;;  %v1691_v25 = vld [vmem:[#allocation7 + $0x34] ss:$8 sps:$4 sm:$0xff]   ;;  %v1693_v26 = vld [vmem:[#allocation7 + $0x30] ss:$8 sps:$4 sm:$0xff]   ;;  %v1694_v27 = vld [vmem:[#allocation7 + $0x44] ss:$8 sps:$4 sm:$0xff]  }
  0x53   :  { %550 = vmatprep.subr.bf16.mxu1 %v1685_v21  ;;  %v1696_v28 = vld [vmem:[#allocation7 + $0x40] ss:$8 sps:$4 sm:$0xff]   ;;  %v1697_v29 = vld [vmem:[#allocation7 + $0x54] ss:$8 sps:$4 sm:$0xff]   ;;  %v1699_v30 = vld [vmem:[#allocation7 + $0x50] ss:$8 sps:$4 sm:$0xff]  }
  0x54   :  { %175 = vmatpush1.bf16.msra.mxu0 %v1666_v6  ;;  %v1700_v31 = vld [vmem:[#allocation7 + $0x64] ss:$8 sps:$4 sm:$0xff]   ;;  %v1702_v32 = vld [vmem:[#allocation7 + $0x60] ss:$8 sps:$4 sm:$0xff]   ;;  %v1703_v33 = vld [vmem:[#allocation7 + $0x74] ss:$8 sps:$4 sm:$0xff]  }
  0x55   :  { %176 = vmatprep.subr.bf16.mxu0 %v1667_v7  ;;  %v1705_v34 = vld [vmem:[#allocation7 + $0x70] ss:$8 sps:$4 sm:$0xff]   ;;  %v1706_v35 = vld [vmem:[#allocation7 + $0x84] ss:$8 sps:$4 sm:$0xff]   ;;  %v1708_v36 = vld [vmem:[#allocation7 + $0x80] ss:$8 sps:$4 sm:$0xff]  }
  0x56   :  { %551 = vmatpush1.bf16.msra.mxu1 %v1687_v22  ;;  %v1709_v37 = vld [vmem:[#allocation7 + $0x94] ss:$8 sps:$4 sm:$0xff]   ;;  %v1711_v38 = vld [vmem:[#allocation7 + $0x90] ss:$8 sps:$4 sm:$0xff]   ;;  %v1712_v39 = vld [vmem:[#allocation7 + $0xa4] ss:$8 sps:$4 sm:$0xff]  }
  0x57   :  { %552 = vmatprep.subr.bf16.mxu1 %v1688_v23  ;;  %v1714_v40 = vld [vmem:[#allocation7 + $0xa0] ss:$8 sps:$4 sm:$0xff]   ;;  %v1715_v41 = vld [vmem:[#allocation7 + $0xb4] ss:$8 sps:$4 sm:$0xff]   ;;  %v1717_v42 = vld [vmem:[#allocation7 + $0xb0] ss:$8 sps:$4 sm:$0xff]  }
  0x58   :  { %177 = vmatpush1.bf16.msra.mxu0 %v1669_v8  ;;  %v1718_v43 = vld [vmem:[#allocation7 + $0xc4] ss:$8 sps:$4 sm:$0xff]   ;;  %v1720_v44 = vld [vmem:[#allocation7 + $0xc0] ss:$8 sps:$4 sm:$0xff]   ;;  %v1721_v45 = vld [vmem:[#allocation7 + $0xd4] ss:$8 sps:$4 sm:$0xff]  }
  0x59   :  { %178 = vmatprep.subr.bf16.mxu0 %v1670_v9  ;;  %v1723_v46 = vld [vmem:[#allocation7 + $0xd0] ss:$8 sps:$4 sm:$0xff]   ;;  %v1724_v47 = vld [vmem:[#allocation7 + $0xe4] ss:$8 sps:$4 sm:$0xff]   ;;  %v1726_v48 = vld [vmem:[#allocation7 + $0xe0] ss:$8 sps:$4 sm:$0xff]  }
  0x5a   :  { %553 = vmatpush1.bf16.msra.mxu1 %v1690_v24  ;;  %v1727_v49 = vld [vmem:[#allocation7 + $0xf4] ss:$8 sps:$4 sm:$0xff]   ;;  %v1729_v50 = vld [vmem:[#allocation7 + $0xf0] ss:$8 sps:$4 sm:$0xff]   ;;  %s1970_s3 = smov [#allocation10]  }
  0x5b   :  { %554 = vmatprep.subr.bf16.mxu1 %v1691_v25  ;;  %s1524_s12 = sshll.u32 %s1970_s3, 4  ;;  %s1525_s12 = int_to_ptr.vmem [resolvable:$true] %s1524_s12 }
  0x5c   :  { %179 = vmatpush1.bf16.msra.mxu0 %v1672_v10  ;;  %s1930_s13 = scalar_lea.vmem %s1525_s12, 128  ;;  %p1935_p5 = scmp.lt.s32.totalorder %s1525_s12, %s1525_s12 }
  0x5d   :  { %180 = vmatprep.subr.bf16.mxu0 %v1673_v11  ;;  %p1931_p4 = scmp.ne.s32.totalorder %s1525_s12, %s1930_s13  ;;  %p1936_p6 = scmp.lt.s32.totalorder %s1930_s13, %s1930_s13 }
  0x5e   :  { %555 = vmatpush1.bf16.msra.mxu1 %v1693_v26 }
  0x5f   :  { %556 = vmatprep.subr.bf16.mxu1 %v1694_v27  ;;  %p1937_p7 = por %p1936_p6, %p1935_p5 }
  0x60   :  { %181 = vmatpush1.bf16.msra.mxu0 %v1675_v12 }
  0x61   :  { %182 = vmatprep.subr.bf16.mxu0 %v1676_v13  ;;  %p1938_p8 = pnand %p1937_p7, %p1931_p4 }
  0x62   :  { %557 = vmatpush1.bf16.msra.mxu1 %v1696_v28 }
  0x63   :  { %558 = vmatprep.subr.bf16.mxu1 %v1697_v29 }
  0x64   :  { %183 = vmatpush1.bf16.msra.mxu0 %v1678_v14 }
  0x65   :  { %184 = vmatprep.subr.bf16.mxu0 %v1679_v15 }
  0x66   :  { %559 = vmatpush1.bf16.msra.mxu1 %v1699_v30  ;;  %v1969_v30 = vmov 1966171168  }
  0x67   :  { %560 = vmatprep.subr.bf16.mxu1 %v1700_v31  ;;  %v258_v31 = vunpack.c.l.s4 %v1969_v30  ;;  %v1754_v30 = vld [vmem:[#allocation7 + $0x180] ss:$8 sps:$4 sm:$0xff]  }
  0x68   :  { %185 = vmatpush1.bf16.msra.mxu0 %v1681_v16 }
  0x6a   :  { %561 = vmatpush1.bf16.msra.mxu1 %v1702_v32  ;;  %v260_v32 = vlaneseq }
  0x6b   :  { %203 = vmatmul.mubr.bf16.vlgmr.msra.gmra.mrb[0].mxu0 %v89_v18  ;;  %562 = vmatprep.subr.bf16.mxu1 %v1703_v33  ;;  %v259_v33 = vunpack.c.0.s8 %v258_v31  ;;  %v1759_v31 = vld [vmem:[#allocation7 + $0x194] ss:$8 sps:$4 sm:$0xff]  }
  0x6e   :  { %563 = vmatpush1.bf16.msra.mxu1 %v1705_v34  ;;  %v261_v34 = vshrl.u32 %v260_v32, 7  ;;  %v1757_v32 = vld [vmem:[#allocation7 + $0x190] ss:$8 sps:$4 sm:$0xff]  }
  0x6f   :  { %564 = vmatprep.subr.bf16.mxu1 %v1706_v35 }
  0x72   :  { %565 = vmatpush1.bf16.msra.mxu1 %v1708_v36  ;;  %v2063_v36 = vsub.s32 %v259_v33, %v261_v34  ;;  %v1762_v33 = vld [vmem:[#allocation7 + $0x1a4] ss:$8 sps:$4 sm:$0xff]  }
  0x73   :  { %566 = vmatprep.subr.bf16.mxu1 %v1709_v37 }
  0x76   :  { %567 = vmatpush1.bf16.msra.mxu1 %v1711_v38 }
  0x77   :  { %568 = vmatprep.subr.bf16.mxu1 %v1712_v39 }
  0x7a   :  { %569 = vmatpush1.bf16.msra.mxu1 %v1714_v40  ;;  %v247_v40 = vld [vmem:[#allocation8] ss:$8 sm:$0x3] }
  0x7b   :  { %570 = vmatprep.subr.bf16.mxu1 %v1715_v41 }
  0x7e   :  { %571 = vmatpush1.bf16.msra.mxu1 %v1717_v42  ;;  %v2067_v42 = vsub.s32 0, %v261_v34 }
  0x7f   :  { %572 = vmatprep.subr.bf16.mxu1 %v1718_v43  ;;  %v2069_v43 = vsub.s32 1, %v261_v34  ;;  %v1760_v34 = vld [vmem:[#allocation7 + $0x1a0] ss:$8 sps:$4 sm:$0xff]  }
  0x82   :  { %573 = vmatpush1.bf16.msra.mxu1 %v1720_v44 }
  0x83   :  { %574 = vmatprep.subr.bf16.mxu1 %v1721_v45 }
  0x86   :  { %575 = vmatpush1.bf16.msra.mxu1 %v1723_v46 }
  0x87   :  { %576 = vmatprep.subr.bf16.mxu1 %v1724_v47 }
  0x8a   :  { %577 = vmatpush1.bf16.msra.mxu1 %v1726_v48 }
  0x8b   :  { %578 = vmatprep.subr.bf16.mxu1 %v1727_v49 }
  0x8e   :  { %579 = vmatpush1.bf16.msra.mxu1 %v1729_v50 }
 0x13e   :  { %v2051_v51 = vpop.f32.mrb[0].mxu0 }
 0x13f   :  { %v211_v52 = vrot.slane %v2051_v51, 4  ;;  %v225_v53 = vmul.f32 %v2051_v51, %v2051_v51  ;;  %v2056_v54 = vpop.f32.mrb[1].mxu0 }
 0x140   :  { %v217_v55 = vrot.slane %v2056_v54, 4  ;;  %v226_v56 = vmul.f32 %v2056_v54, %v2056_v54  ;;  %v208_v57 = vpop.f32.mrb[2].mxu0 }
 0x141   :  { %v212_v58 = vadd.f32 %v211_v52, %v2051_v51  ;;  %v227_v59 = vrot.slane %v225_v53, 4  ;;  %v209_v60 = vpop.f32.mrb[3].mxu0  ;;  %v306_v57 = vpack.c.bf16 %v2056_v54, %v2056_v54 }
 0x142   :  { %v218_v61 = vadd.f32 %v217_v55, %v2056_v54  ;;  %v233_v62 = vrot.slane %v226_v56, 4 }
 0x143   :  { %v213_v63 = vrot.slane %v212_v58, 2  ;;  %v228_v1 = vadd.f32 %v227_v59, %v225_v53 }
 0x144   :  { %v219_v2 = vrot.slane %v218_v61, 2  ;;  %v234_v3 = vadd.f32 %v233_v62, %v226_v56  ;;  %v305_v56 = vpack.c.bf16 %v2051_v51, %v2051_v51 }
 0x145   :  { %v214_v4 = vadd.f32 %v213_v63, %v212_v58  ;;  %v229_v5 = vrot.slane %v228_v1, 2 }
 0x146   :  { %v220_v6 = vadd.f32 %v219_v2, %v218_v61  ;;  %v235_v7 = vrot.slane %v234_v3, 2  ;;  %v249_v61 = vld [vmem:[#allocation8 + $0x4] ss:$8 sm:$0x3] }
 0x147   :  { %v215_v8 = vrot.slane %v214_v4, 1  ;;  %v230_v9 = vadd.f32 %v229_v5, %v228_v1 }
 0x148   :  { %v221_v10 = vrot.slane %v220_v6, 1  ;;  %v236_v11 = vadd.f32 %v235_v7, %v234_v3 }
 0x149   :  { %v216_v12 = vadd.f32 %v215_v8, %v214_v4  ;;  %v231_v13 = vrot.slane %v230_v9, 1 }
 0x14a   :  { %v222_v14 = vadd.f32 %v221_v10, %v220_v6  ;;  %v237_v15 = vrot.slane %v236_v11, 1 }
 0x14b   :  { %v223_v16 = vmul.f32 0.125, %v216_v12  ;;  %v232_v17 = vadd.f32 %v231_v13, %v230_v9  ;;  %v1732_v13 = vld [vmem:[#allocation7 + $0x104] ss:$8 sps:$4 sm:$0xff]  }
 0x14c   :  { %v224_v18 = vmul.f32 0.125, %v222_v14  ;;  %v238_v19 = vadd.f32 %v237_v15, %v236_v11  ;;  %v1730_v14 = vld [vmem:[#allocation7 + $0x100] ss:$8 sps:$4 sm:$0xff]   ;;  %928 = vmatprep.subr.bf16.mxu0 %v1732_v13  ;;  %v1735_v15 = vld [vmem:[#allocation7 + $0x114] ss:$8 sps:$4 sm:$0xff]  }
 0x14d   :  { %v239_v20 = vmul.f32 0.125, %v232_v17  ;;  %v241_v21 = vmul.f32 %v223_v16, %v223_v16  ;;  %929 = vmatpush1.bf16.msra.mxu0 %v1730_v14  ;;  %v1738_v17 = vld [vmem:[#allocation7 + $0x124] ss:$8 sps:$4 sm:$0xff]  }
 0x14e   :  { %v240_v22 = vmul.f32 0.125, %v238_v19  ;;  %v242_v23 = vmul.f32 %v224_v18, %v224_v18  ;;  %930 = vmatprep.subr.bf16.mxu0 %v1735_v15  ;;  %v1741_v19 = vld [vmem:[#allocation7 + $0x134] ss:$8 sps:$4 sm:$0xff]  }
 0x14f   :  { %v243_v24 = vsub.f32 %v239_v20, %v241_v21  ;;  %v1739_v20 = vld [vmem:[#allocation7 + $0x130] ss:$8 sps:$4 sm:$0xff]   ;;  %v1744_v21 = vld [vmem:[#allocation7 + $0x144] ss:$8 sps:$4 sm:$0xff]  }
 0x150   :  { %v244_v25 = vsub.f32 %v240_v22, %v242_v23  ;;  %v1742_v22 = vld [vmem:[#allocation7 + $0x140] ss:$8 sps:$4 sm:$0xff]   ;;  %v1747_v23 = vld [vmem:[#allocation7 + $0x154] ss:$8 sps:$4 sm:$0xff]  }
 0x151   :  { %v245_v26 = vmax.f32 %v243_v24, 0.0  ;;  %v1745_v24 = vld [vmem:[#allocation7 + $0x150] ss:$8 sps:$4 sm:$0xff]  }
 0x152   :  { %v246_v27 = vmax.f32 %v244_v25, 0.0  ;;  %v1750_v25 = vld [vmem:[#allocation7 + $0x164] ss:$8 sps:$4 sm:$0xff]  }
 0x153   :  { %v250_v28 = vadd.f32 1e-05, %v245_v26  ;;  %v1748_v26 = vld [vmem:[#allocation7 + $0x160] ss:$8 sps:$4 sm:$0xff]  }
 0x154   :  { %v251_v29 = vadd.f32 1e-05, %v246_v27  ;;  %v1753_v27 = vld [vmem:[#allocation7 + $0x174] ss:$8 sps:$4 sm:$0xff]  }
 0x155   :  { %1826 = vrsqrt.f32 %v250_v28  ;;  %v1751_v28 = vld [vmem:[#allocation7 + $0x170] ss:$8 sps:$4 sm:$0xff]  }
 0x156   :  { %1828 = vrsqrt.f32 %v251_v29  ;;  %v1756_v29 = vld [vmem:[#allocation7 + $0x184] ss:$8 sps:$4 sm:$0xff]  }
 0x15f   :  { %v1827_v35 = vpop.eup %1826 }
 0x160   :  { %v1829_v37 = vpop.eup %1828 }
 0x161   :  { %v256_v38 = vcombine.low %v1827_v35, %v1829_v37  ;;  %v1765_v35 = vld [vmem:[#allocation7 + $0x1b4] ss:$8 sps:$4 sm:$0xff]   ;;  %v1763_v37 = vld [vmem:[#allocation7 + $0x1b0] ss:$8 sps:$4 sm:$0xff]  }
 0x163   :  { %v263_v39 = vrot.slane %v256_v38, %v2063_v36  ;;  %v1768_v38 = vld [vmem:[#allocation7 + $0x1c4] ss:$8 sps:$4 sm:$0xff]  }
 0x165   :  { %v270_v41 = vrot.slane %v263_v39, %v2063_v36  ;;  %v1766_v39 = vld [vmem:[#allocation7 + $0x1c0] ss:$8 sps:$4 sm:$0xff]  }
 0x167   :  { %v272_v44 = vmul.f32 %v270_v41, %v247_v40  ;;  %v1771_v40 = vld [vmem:[#allocation7 + $0x1d4] ss:$8 sps:$4 sm:$0xff]   ;;  %v1769_v41 = vld [vmem:[#allocation7 + $0x1d0] ss:$8 sps:$4 sm:$0xff]  }
 0x169   :  { %v277_v45 = vrot.slane %v272_v44, %v2067_v42  ;;  %v281_v46 = vrot.slane %v272_v44, %v2069_v43  ;;  %v1774_v44 = vld [vmem:[#allocation7 + $0x1e4] ss:$8 sps:$4 sm:$0xff]  }
 0x16b   :  { %v284_v47 = vmul.f32 %v277_v45, %v223_v16  ;;  %v285_v48 = vmul.f32 %v281_v46, %v224_v18  ;;  %v308_v49 = vpack.c.bf16 %v281_v46, %v281_v46  ;;  %v307_v50 = vpack.c.bf16 %v277_v45, %v277_v45  ;;  %v1733_v16 = vld [vmem:[#allocation7 + $0x110] ss:$8 sps:$4 sm:$0xff]   ;;  %v1736_v18 = vld [vmem:[#allocation7 + $0x120] ss:$8 sps:$4 sm:$0xff]   ;;  %v1777_v46 = vld [vmem:[#allocation7 + $0x1f4] ss:$8 sps:$4 sm:$0xff]  }
 0x16c   :  { %931 = vmatpush1.bf16.msra.mxu0 %v1733_v16  ;;  %v1772_v45 = vld [vmem:[#allocation7 + $0x1e0] ss:$8 sps:$4 sm:$0xff]  }
 0x16d   :  { %v288_v52 = vcombine.low %v284_v47, %v285_v48  ;;  %v330_v53 = vpack.i.b16 %v308_v49, %v308_v49  ;;  %v323_v55 = vpack.i.b16 %v307_v50, %v307_v50  ;;  %932 = vmatprep.subr.bf16.mxu0 %v1738_v17  ;;  %v1775_v47 = vld [vmem:[#allocation7 + $0x1f0] ss:$8 sps:$4 sm:$0xff]  }
 0x16f   :  { %v295_v58 = vrot.slane %v288_v52, %v2063_v36  ;;  %v335_v59 = vrot.slane %v330_v53, %v2067_v42  ;;  %v328_v60 = vrot.slane %v323_v55, %v2067_v42 }
 0x170   :  { %933 = vmatpush1.bf16.msra.mxu0 %v1736_v18 }
 0x171   :  { %v302_v62 = vrot.slane %v295_v58, %v2063_v36  ;;  %v337_v63 = vmul.bf16 %v335_v59, %v306_v57  ;;  %v336_v1 = vmul.bf16 %v328_v60, %v305_v56  ;;  %934 = vmatprep.subr.bf16.mxu0 %v1741_v19 }
 0x173   :  { %v304_v2 = vsub.f32 %v249_v61, %v302_v62 }
 0x174   :  { %935 = vmatpush1.bf16.msra.mxu0 %v1739_v20 }
 0x175   :  { %v317_v3 = vrot.slane %v304_v2, %v2069_v43  ;;  %v313_v4 = vrot.slane %v304_v2, %v2067_v42  ;;  %936 = vmatprep.subr.bf16.mxu0 %v1744_v21 }
 0x177   :  { %v321_v51 = vpack.c.bf16 %v317_v3, %v317_v3  ;;  %v320_v5 = vpack.c.bf16 %v313_v4, %v313_v4 }
 0x178   :  { %937 = vmatpush1.bf16.msra.mxu0 %v1742_v22 }
 0x179   :  { %v346_v6 = vpack.i.b16 %v321_v51, %v321_v51  ;;  %v339_v54 = vpack.i.b16 %v320_v5, %v320_v5  ;;  %938 = vmatprep.subr.bf16.mxu0 %v1747_v23 }
 0x17b   :  { %v351_v7 = vrot.slane %v346_v6, %v2067_v42  ;;  %v344_v8 = vrot.slane %v339_v54, %v2067_v42 }
 0x17c   :  { %939 = vmatpush1.bf16.msra.mxu0 %v1745_v24 }
 0x17d   :  { %v353_v9 = vadd.bf16 %v351_v7, %v337_v63  ;;  %v352_v10 = vadd.bf16 %v344_v8, %v336_v1  ;;  %940 = vmatprep.subr.bf16.mxu0 %v1750_v25 }
 0x17f   :  { %v355_v11 = vmax.bf16 %v1968_v0, %v353_v9  ;;  %v354_v12 = vmax.bf16 %v1968_v0, %v352_v10 }
 0x180   :  { %941 = vmatpush1.bf16.msra.mxu0 %v1748_v26 }
 0x181   :  { %580 = vmatprep.mubr.bf16.mxu1 %v355_v11  ;;  %942 = vmatprep.subr.bf16.mxu0 %v1753_v27 }
 0x182   :  { %581 = vmatmul.mubr.bf16.vlgmr.msra.gmra.mrb[0].mxu1 %v354_v12 }
 0x184   :  { %943 = vmatpush1.bf16.msra.mxu0 %v1751_v28 }
 0x185   :  { %944 = vmatprep.subr.bf16.mxu0 %v1756_v29 }
 0x188   :  { %945 = vmatpush1.bf16.msra.mxu0 %v1754_v30 }
 0x189   :  { %946 = vmatprep.subr.bf16.mxu0 %v1759_v31  ;;  %v626_v31 = vld [vmem:[#allocation8 + $0x1] ss:$8 sm:$0x3] }
 0x18c   :  { %947 = vmatpush1.bf16.msra.mxu0 %v1757_v32 }
 0x18d   :  { %948 = vmatprep.subr.bf16.mxu0 %v1762_v33 }
 0x190   :  { %949 = vmatpush1.bf16.msra.mxu0 %v1760_v34 }
 0x191   :  { %950 = vmatprep.subr.bf16.mxu0 %v1765_v35 }
 0x194   :  { %951 = vmatpush1.bf16.msra.mxu0 %v1763_v37 }
 0x195   :  { %952 = vmatprep.subr.bf16.mxu0 %v1768_v38 }
 0x198   :  { %953 = vmatpush1.bf16.msra.mxu0 %v1766_v39 }
 0x199   :  { %954 = vmatprep.subr.bf16.mxu0 %v1771_v40 }
 0x19c   :  { %955 = vmatpush1.bf16.msra.mxu0 %v1769_v41 }
 0x19d   :  { %956 = vmatprep.subr.bf16.mxu0 %v1774_v44 }
 0x1a0   :  { %957 = vmatpush1.bf16.msra.mxu0 %v1772_v45 }
 0x1a1   :  { %958 = vmatprep.subr.bf16.mxu0 %v1777_v46 }
 0x1a4   :  { %959 = vmatpush1.bf16.msra.mxu0 %v1775_v47 }
 0x255   :  { %v2087_v48 = vpop.f32.mrb[0].mxu1 }
 0x256   :  { %v589_v49 = vrot.slane %v2087_v48, 4  ;;  %v603_v50 = vmul.f32 %v2087_v48, %v2087_v48  ;;  %v2092_v52 = vpop.f32.mrb[1].mxu1  ;;  %v684_v46 = vpack.c.bf16 %v2087_v48, %v2087_v48 }
 0x257   :  { %v595_v53 = vrot.slane %v2092_v52, 4  ;;  %v604_v55 = vmul.f32 %v2092_v52, %v2092_v52  ;;  %v586_v56 = vpop.f32.mrb[2].mxu1 }
 0x258   :  { %v590_v57 = vadd.f32 %v589_v49, %v2087_v48  ;;  %v605_v58 = vrot.slane %v603_v50, 4  ;;  %v587_v59 = vpop.f32.mrb[3].mxu1  ;;  %v685_v49 = vpack.c.bf16 %v2092_v52, %v2092_v52 }
 0x259   :  { %v596_v60 = vadd.f32 %v595_v53, %v2092_v52  ;;  %v611_v61 = vrot.slane %v604_v55, 4 }
 0x25a   :  { %v591_v62 = vrot.slane %v590_v57, 2  ;;  %v606_v63 = vadd.f32 %v605_v58, %v603_v50 }
 0x25b   :  { %v597_v1 = vrot.slane %v596_v60, 2  ;;  %v612_v2 = vadd.f32 %v611_v61, %v604_v55  ;;  %v628_v55 = vld [vmem:[#allocation8 + $0x5] ss:$8 sm:$0x3] }
 0x25c   :  { %v592_v3 = vadd.f32 %v591_v62, %v590_v57  ;;  %v607_v4 = vrot.slane %v606_v63, 2 }
 0x25d   :  { %v598_v51 = vadd.f32 %v597_v1, %v596_v60  ;;  %v613_v5 = vrot.slane %v612_v2, 2 }
 0x25e   :  { %v593_v6 = vrot.slane %v592_v3, 1  ;;  %v608_v54 = vadd.f32 %v607_v4, %v606_v63 }
 0x25f   :  { %v599_v7 = vrot.slane %v598_v51, 1  ;;  %v614_v8 = vadd.f32 %v613_v5, %v612_v2 }
 0x260   :  { %v594_v9 = vadd.f32 %v593_v6, %v592_v3  ;;  %v609_v10 = vrot.slane %v608_v54, 1  ;;  %v1780_v6 = vld [vmem:[#allocation7 + $0x204] ss:$8 sps:$4 sm:$0xff]  }
 0x261   :  { %v600_v11 = vadd.f32 %v599_v7, %v598_v51  ;;  %v615_v12 = vrot.slane %v614_v8, 1  ;;  %1308 = vmatprep.subr.bf16.mxu1 %v1780_v6  ;;  %v1783_v7 = vld [vmem:[#allocation7 + $0x214] ss:$8 sps:$4 sm:$0xff]  }
 0x262   :  { %v601_v13 = vmul.f32 0.125, %v594_v9  ;;  %v610_v14 = vadd.f32 %v609_v10, %v608_v54  ;;  %v1778_v54 = vld [vmem:[#allocation7 + $0x200] ss:$8 sps:$4 sm:$0xff]   ;;  %v1786_v9 = vld [vmem:[#allocation7 + $0x224] ss:$8 sps:$4 sm:$0xff]  }
 0x263   :  { %v602_v15 = vmul.f32 0.125, %v600_v11  ;;  %v616_v16 = vadd.f32 %v615_v12, %v614_v8  ;;  %1309 = vmatpush1.bf16.msra.mxu1 %v1778_v54  ;;  %v1781_v8 = vld [vmem:[#allocation7 + $0x210] ss:$8 sps:$4 sm:$0xff]   ;;  %v1784_v10 = vld [vmem:[#allocation7 + $0x220] ss:$8 sps:$4 sm:$0xff]  }
 0x264   :  { %v617_v17 = vmul.f32 0.125, %v610_v14  ;;  %v619_v18 = vmul.f32 %v601_v13, %v601_v13  ;;  %1310 = vmatprep.subr.bf16.mxu1 %v1783_v7  ;;  %v1789_v11 = vld [vmem:[#allocation7 + $0x234] ss:$8 sps:$4 sm:$0xff]   ;;  %v1787_v12 = vld [vmem:[#allocation7 + $0x230] ss:$8 sps:$4 sm:$0xff]  }
 0x265   :  { %v618_v19 = vmul.f32 0.125, %v616_v16  ;;  %v620_v20 = vmul.f32 %v602_v15, %v602_v15  ;;  %v1790_v14 = vld [vmem:[#allocation7 + $0x240] ss:$8 sps:$4 sm:$0xff]   ;;  %v1793_v16 = vld [vmem:[#allocation7 + $0x250] ss:$8 sps:$4 sm:$0xff]  }
 0x266   :  { %v621_v21 = vsub.f32 %v617_v17, %v619_v18  ;;  %v1798_v17 = vld [vmem:[#allocation7 + $0x264] ss:$8 sps:$4 sm:$0xff]   ;;  %v1796_v18 = vld [vmem:[#allocation7 + $0x260] ss:$8 sps:$4 sm:$0xff]  }
 0x267   :  { %v622_v22 = vsub.f32 %v618_v19, %v620_v20  ;;  %1311 = vmatpush1.bf16.msra.mxu1 %v1781_v8  ;;  %v1801_v19 = vld [vmem:[#allocation7 + $0x274] ss:$8 sps:$4 sm:$0xff]   ;;  %v1799_v20 = vld [vmem:[#allocation7 + $0x270] ss:$8 sps:$4 sm:$0xff]  }
 0x268   :  { %v623_v23 = vmax.f32 %v621_v21, 0.0  ;;  %1312 = vmatprep.subr.bf16.mxu1 %v1786_v9  ;;  %v1804_v21 = vld [vmem:[#allocation7 + $0x284] ss:$8 sps:$4 sm:$0xff]  }
 0x269   :  { %v624_v24 = vmax.f32 %v622_v22, 0.0  ;;  %v1802_v22 = vld [vmem:[#allocation7 + $0x280] ss:$8 sps:$4 sm:$0xff]  }
 0x26a   :  { %v629_v25 = vadd.f32 1e-05, %v623_v23  ;;  %v1807_v23 = vld [vmem:[#allocation7 + $0x294] ss:$8 sps:$4 sm:$0xff]  }
 0x26b   :  { %v630_v26 = vadd.f32 1e-05, %v624_v24  ;;  %1313 = vmatpush1.bf16.msra.mxu1 %v1784_v10  ;;  %v1805_v24 = vld [vmem:[#allocation7 + $0x290] ss:$8 sps:$4 sm:$0xff]  }
 0x26c   :  { %1830 = vrsqrt.f32 %v629_v25  ;;  %1314 = vmatprep.subr.bf16.mxu1 %v1789_v11  ;;  %v1810_v25 = vld [vmem:[#allocation7 + $0x2a4] ss:$8 sps:$4 sm:$0xff]  }
 0x26d   :  { %1832 = vrsqrt.f32 %v630_v26  ;;  %v1808_v26 = vld [vmem:[#allocation7 + $0x2a0] ss:$8 sps:$4 sm:$0xff]  }
 0x26f   :  { %1315 = vmatpush1.bf16.msra.mxu1 %v1787_v12 }
 0x276   :  { %v1831_v27 = vpop.eup %1830 }
 0x277   :  { %v1833_v28 = vpop.eup %1832 }
 0x278   :  { %v635_v29 = vcombine.low %v1831_v27, %v1833_v28  ;;  %v1813_v27 = vld [vmem:[#allocation7 + $0x2b4] ss:$8 sps:$4 sm:$0xff]   ;;  %v1811_v28 = vld [vmem:[#allocation7 + $0x2b0] ss:$8 sps:$4 sm:$0xff]  }
 0x27a   :  { %v642_v30 = vrot.slane %v635_v29, %v2063_v36  ;;  %v1816_v29 = vld [vmem:[#allocation7 + $0x2c4] ss:$8 sps:$4 sm:$0xff]  }
 0x27c   :  { %v649_v32 = vrot.slane %v642_v30, %v2063_v36  ;;  %v1814_v30 = vld [vmem:[#allocation7 + $0x2c0] ss:$8 sps:$4 sm:$0xff]  }
 0x27e   :  { %v651_v33 = vmul.f32 %v649_v32, %v626_v31  ;;  %v1819_v31 = vld [vmem:[#allocation7 + $0x2d4] ss:$8 sps:$4 sm:$0xff]   ;;  %v1817_v32 = vld [vmem:[#allocation7 + $0x2d0] ss:$8 sps:$4 sm:$0xff]  }
 0x280   :  { %v656_v34 = vrot.slane %v651_v33, %v2067_v42  ;;  %v660_v35 = vrot.slane %v651_v33, %v2069_v43  ;;  %v1822_v33 = vld [vmem:[#allocation7 + $0x2e4] ss:$8 sps:$4 sm:$0xff]  }
 0x282   :  { %v663_v37 = vmul.f32 %v656_v34, %v601_v13  ;;  %v664_v38 = vmul.f32 %v660_v35, %v602_v15  ;;  %v687_v39 = vpack.c.bf16 %v660_v35, %v660_v35  ;;  %v686_v40 = vpack.c.bf16 %v656_v34, %v656_v34  ;;  %v1792_v13 = vld [vmem:[#allocation7 + $0x244] ss:$8 sps:$4 sm:$0xff]   ;;  %v1795_v15 = vld [vmem:[#allocation7 + $0x254] ss:$8 sps:$4 sm:$0xff]   ;;  %v1820_v34 = vld [vmem:[#allocation7 + $0x2e0] ss:$8 sps:$4 sm:$0xff]  }
 0x283   :  { %1316 = vmatprep.subr.bf16.mxu1 %v1792_v13  ;;  %v1825_v35 = vld [vmem:[#allocation7 + $0x2f4] ss:$8 sps:$4 sm:$0xff]  }
 0x284   :  { %v667_v41 = vcombine.low %v663_v37, %v664_v38  ;;  %v709_v44 = vpack.i.b16 %v687_v39, %v687_v39  ;;  %v702_v45 = vpack.i.b16 %v686_v40, %v686_v40  ;;  %1317 = vmatpush1.bf16.msra.mxu1 %v1790_v14  ;;  %v1823_v37 = vld [vmem:[#allocation7 + $0x2f0] ss:$8 sps:$4 sm:$0xff]  }
 0x285   :  { %1318 = vmatprep.subr.bf16.mxu1 %v1795_v15 }
 0x286   :  { %v674_v47 = vrot.slane %v667_v41, %v2063_v36  ;;  %v714_v50 = vrot.slane %v709_v44, %v2067_v42  ;;  %v707_v53 = vrot.slane %v702_v45, %v2067_v42 }
 0x288   :  { %v716_v56 = vmul.bf16 %v714_v50, %v685_v49  ;;  %v681_v57 = vrot.slane %v674_v47, %v2063_v36  ;;  %v715_v58 = vmul.bf16 %v707_v53, %v684_v46  ;;  %1319 = vmatpush1.bf16.msra.mxu1 %v1793_v16 }
 0x289   :  { %1320 = vmatprep.subr.bf16.mxu1 %v1798_v17 }
 0x28a   :  { %v683_v59 = vsub.f32 %v628_v55, %v681_v57 }
 0x28c   :  { %v696_v60 = vrot.slane %v683_v59, %v2069_v43  ;;  %v692_v61 = vrot.slane %v683_v59, %v2067_v42  ;;  %1321 = vmatpush1.bf16.msra.mxu1 %v1796_v18 }
 0x28d   :  { %1322 = vmatprep.subr.bf16.mxu1 %v1801_v19 }
 0x28e   :  { %v700_v48 = vpack.c.bf16 %v696_v60, %v696_v60  ;;  %v699_v62 = vpack.c.bf16 %v692_v61, %v692_v61 }
 0x290   :  { %v725_v63 = vpack.i.b16 %v700_v48, %v700_v48  ;;  %v718_v1 = vpack.i.b16 %v699_v62, %v699_v62  ;;  %1323 = vmatpush1.bf16.msra.mxu1 %v1799_v20 }
 0x291   :  { %1324 = vmatprep.subr.bf16.mxu1 %v1804_v21 }
 0x292   :  { %v730_v52 = vrot.slane %v725_v63, %v2067_v42  ;;  %v723_v2 = vrot.slane %v718_v1, %v2067_v42 }
 0x294   :  { %v732_v3 = vadd.bf16 %v730_v52, %v716_v56  ;;  %v731_v4 = vadd.bf16 %v723_v2, %v715_v58  ;;  %1325 = vmatpush1.bf16.msra.mxu1 %v1802_v22 }
 0x295   :  { %1326 = vmatprep.subr.bf16.mxu1 %v1807_v23  ;;  %v1006_v23 = vld [vmem:[#allocation8 + $0x2] ss:$8 sm:$0x3] }
 0x296   :  { %v734_v51 = vmax.bf16 %v1968_v0, %v732_v3  ;;  %v733_v5 = vmax.bf16 %v1968_v0, %v731_v4 }
 0x298   :  { %960 = vmatprep.mubr.bf16.mxu0 %v734_v51  ;;  %1327 = vmatpush1.bf16.msra.mxu1 %v1805_v24 }
 0x299   :  { %961 = vmatmul.mubr.bf16.vlgmr.msra.gmra.mrb[4].mxu0 %v733_v5  ;;  %1328 = vmatprep.subr.bf16.mxu1 %v1810_v25 }
 0x29c   :  { %1329 = vmatpush1.bf16.msra.mxu1 %v1808_v26 }
 0x29d   :  { %1330 = vmatprep.subr.bf16.mxu1 %v1813_v27 }
 0x2a0   :  { %1331 = vmatpush1.bf16.msra.mxu1 %v1811_v28 }
 0x2a1   :  { %1332 = vmatprep.subr.bf16.mxu1 %v1816_v29 }
 0x2a4   :  { %1333 = vmatpush1.bf16.msra.mxu1 %v1814_v30 }
 0x2a5   :  { %1334 = vmatprep.subr.bf16.mxu1 %v1819_v31 }
 0x2a8   :  { %1335 = vmatpush1.bf16.msra.mxu1 %v1817_v32 }
 0x2a9   :  { %1336 = vmatprep.subr.bf16.mxu1 %v1822_v33 }
 0x2ac   :  { %1337 = vmatpush1.bf16.msra.mxu1 %v1820_v34 }
 0x2ad   :  { %1338 = vmatprep.subr.bf16.mxu1 %v1825_v35 }
 0x2b0   :  { %1339 = vmatpush1.bf16.msra.mxu1 %v1823_v37 }
 0x36c   :  { %v2117_v38 = vpop.f32.mrb[4].mxu0 }
 0x36d   :  { %v969_v39 = vrot.slane %v2117_v38, 4  ;;  %v983_v40 = vmul.f32 %v2117_v38, %v2117_v38  ;;  %v2122_v41 = vpop.f32.mrb[5].mxu0  ;;  %v1064_v35 = vpack.c.bf16 %v2117_v38, %v2117_v38 }
 0x36e   :  { %v975_v44 = vrot.slane %v2122_v41, 4  ;;  %v984_v45 = vmul.f32 %v2122_v41, %v2122_v41  ;;  %v966_v46 = vpop.f32.mrb[6].mxu0 }
 0x36f   :  { %v970_v47 = vadd.f32 %v969_v39, %v2117_v38  ;;  %v985_v49 = vrot.slane %v983_v40, 4  ;;  %v967_v50 = vpop.f32.mrb[7].mxu0  ;;  %v1065_v39 = vpack.c.bf16 %v2122_v41, %v2122_v41 }
 0x370   :  { %v976_v53 = vadd.f32 %v975_v44, %v2122_v41  ;;  %v991_v55 = vrot.slane %v984_v45, 4 }
 0x371   :  { %v971_v56 = vrot.slane %v970_v47, 2  ;;  %v986_v57 = vadd.f32 %v985_v49, %v983_v40 }
 0x372   :  { %v977_v58 = vrot.slane %v976_v53, 2  ;;  %v992_v59 = vadd.f32 %v991_v55, %v984_v45  ;;  %v1008_v45 = vld [vmem:[#allocation8 + $0x6] ss:$8 sm:$0x3] }
 0x373   :  { %v972_v60 = vadd.f32 %v971_v56, %v970_v47  ;;  %v987_v61 = vrot.slane %v986_v57, 2 }
 0x374   :  { %v978_v48 = vadd.f32 %v977_v58, %v976_v53  ;;  %v993_v62 = vrot.slane %v992_v59, 2 }
 0x375   :  { %v973_v63 = vrot.slane %v972_v60, 1  ;;  %v988_v1 = vadd.f32 %v987_v61, %v986_v57 }
 0x376   :  { %v979_v52 = vrot.slane %v978_v48, 1  ;;  %v994_v2 = vadd.f32 %v993_v62, %v992_v59 }
 0x377   :  { %v974_v3 = vadd.f32 %v973_v63, %v972_v60  ;;  %v989_v4 = vrot.slane %v988_v1, 1 }
 0x378   :  { %v980_v51 = vadd.f32 %v979_v52, %v978_v48  ;;  %v995_v5 = vrot.slane %v994_v2, 1 }
 0x379   :  { %v981_v6 = vmul.f32 0.125, %v974_v3  ;;  %v990_v54 = vadd.f32 %v989_v4, %v988_v1 }
 0x37a   :  { %v982_v7 = vmul.f32 0.125, %v980_v51  ;;  %v996_v8 = vadd.f32 %v995_v5, %v994_v2 }
 0x37b   :  { %v997_v9 = vmul.f32 0.125, %v990_v54  ;;  %v999_v10 = vmul.f32 %v981_v6, %v981_v6 }
 0x37c   :  { %v998_v11 = vmul.f32 0.125, %v996_v8  ;;  %v1000_v12 = vmul.f32 %v982_v7, %v982_v7 }
 0x37d   :  { %v1001_v13 = vsub.f32 %v997_v9, %v999_v10 }
 0x37e   :  { %v1002_v14 = vsub.f32 %v998_v11, %v1000_v12 }
 0x37f   :  { %v1003_v15 = vmax.f32 %v1001_v13, 0.0 }
 0x380   :  { %v1004_v16 = vmax.f32 %v1002_v14, 0.0 }
 0x381   :  { %v1009_v17 = vadd.f32 1e-05, %v1003_v15 }
 0x382   :  { %v1010_v18 = vadd.f32 1e-05, %v1004_v16 }
 0x383   :  { %1834 = vrsqrt.f32 %v1009_v17 }
 0x384   :  { %1836 = vrsqrt.f32 %v1010_v18 }
 0x38d   :  { %v1835_v19 = vpop.eup %1834 }
 0x38e   :  { %v1837_v20 = vpop.eup %1836 }
 0x38f   :  { %v1015_v21 = vcombine.low %v1835_v19, %v1837_v20 }
 0x391   :  { %v1022_v22 = vrot.slane %v1015_v21, %v2063_v36 }
 0x393   :  { %v1029_v24 = vrot.slane %v1022_v22, %v2063_v36 }
 0x395   :  { %v1031_v25 = vmul.f32 %v1029_v24, %v1006_v23 }
 0x397   :  { %v1036_v26 = vrot.slane %v1031_v25, %v2067_v42  ;;  %v1040_v27 = vrot.slane %v1031_v25, %v2069_v43 }
 0x399   :  { %v1043_v28 = vmul.f32 %v1036_v26, %v981_v6  ;;  %v1044_v29 = vmul.f32 %v1040_v27, %v982_v7  ;;  %v1067_v30 = vpack.c.bf16 %v1040_v27, %v1040_v27  ;;  %v1066_v31 = vpack.c.bf16 %v1036_v26, %v1036_v26 }
 0x39b   :  { %v1047_v32 = vcombine.low %v1043_v28, %v1044_v29  ;;  %v1089_v33 = vpack.i.b16 %v1067_v30, %v1067_v30  ;;  %v1082_v34 = vpack.i.b16 %v1066_v31, %v1066_v31 }
 0x39d   :  { %v1054_v37 = vrot.slane %v1047_v32, %v2063_v36  ;;  %v1094_v40 = vrot.slane %v1089_v33, %v2067_v42  ;;  %v1087_v44 = vrot.slane %v1082_v34, %v2067_v42 }
 0x39f   :  { %v1096_v46 = vmul.bf16 %v1094_v40, %v1065_v39  ;;  %v1061_v47 = vrot.slane %v1054_v37, %v2063_v36  ;;  %v1095_v49 = vmul.bf16 %v1087_v44, %v1064_v35 }
 0x3a1   :  { %v1063_v50 = vsub.f32 %v1008_v45, %v1061_v47 }
 0x3a3   :  { %v1076_v53 = vrot.slane %v1063_v50, %v2069_v43  ;;  %v1072_v55 = vrot.slane %v1063_v50, %v2067_v42 }
 0x3a5   :  { %v1080_v38 = vpack.c.bf16 %v1076_v53, %v1076_v53  ;;  %v1079_v56 = vpack.c.bf16 %v1072_v55, %v1072_v55 }
 0x3a7   :  { %v1105_v57 = vpack.i.b16 %v1080_v38, %v1080_v38  ;;  %v1098_v58 = vpack.i.b16 %v1079_v56, %v1079_v56 }
 0x3a9   :  { %v1110_v41 = vrot.slane %v1105_v57, %v2067_v42  ;;  %v1103_v59 = vrot.slane %v1098_v58, %v2067_v42 }
 0x3ab   :  { %v1112_v60 = vadd.bf16 %v1110_v41, %v1096_v46  ;;  %v1111_v61 = vadd.bf16 %v1103_v59, %v1095_v49  ;;  %v1386_v49 = vld [vmem:[#allocation8 + $0x3] ss:$8 sm:$0x3] }
 0x3ad   :  { %v1114_v48 = vmax.bf16 %v1968_v0, %v1112_v60  ;;  %v1113_v62 = vmax.bf16 %v1968_v0, %v1111_v61 }
 0x3af   :  { %1340 = vmatprep.mubr.bf16.mxu1 %v1114_v48 }
 0x3b0   :  { %1341 = vmatmul.mubr.bf16.vlgmr.msra.gmra.mrb[4].mxu1 %v1113_v62 }
 0x483   :  { %v2147_v63 = vpop.f32.mrb[4].mxu1 }
 0x484   :  { %v1349_v1 = vrot.slane %v2147_v63, 4  ;;  %v1363_v52 = vmul.f32 %v2147_v63, %v2147_v63  ;;  %v2152_v2 = vpop.f32.mrb[5].mxu1  ;;  %v1444_v48 = vpack.c.bf16 %v2147_v63, %v2147_v63 }
 0x485   :  { %v1355_v3 = vrot.slane %v2152_v2, 4  ;;  %v1364_v4 = vmul.f32 %v2152_v2, %v2152_v2  ;;  %v1346_v51 = vpop.f32.mrb[6].mxu1 }
 0x486   :  { %v1350_v5 = vadd.f32 %v1349_v1, %v2147_v63  ;;  %v1365_v6 = vrot.slane %v1363_v52, 4  ;;  %v1347_v54 = vpop.f32.mrb[7].mxu1  ;;  %v1445_v1 = vpack.c.bf16 %v2152_v2, %v2152_v2 }
 0x487   :  { %v1356_v7 = vadd.f32 %v1355_v3, %v2152_v2  ;;  %v1371_v8 = vrot.slane %v1364_v4, 4 }
 0x488   :  { %v1351_v9 = vrot.slane %v1350_v5, 2  ;;  %v1366_v10 = vadd.f32 %v1365_v6, %v1363_v52 }
 0x489   :  { %v1357_v11 = vrot.slane %v1356_v7, 2  ;;  %v1372_v12 = vadd.f32 %v1371_v8, %v1364_v4  ;;  %v1388_v4 = vld [vmem:[#allocation8 + $0x7] ss:$8 sm:$0x3] }
 0x48a   :  { %v1352_v13 = vadd.f32 %v1351_v9, %v1350_v5  ;;  %v1367_v14 = vrot.slane %v1366_v10, 2 }
 0x48b   :  { %v1358_v15 = vadd.f32 %v1357_v11, %v1356_v7  ;;  %v1373_v16 = vrot.slane %v1372_v12, 2 }
 0x48c   :  { %v1353_v17 = vrot.slane %v1352_v13, 1  ;;  %v1368_v18 = vadd.f32 %v1367_v14, %v1366_v10 }
 0x48d   :  { %v1359_v19 = vrot.slane %v1358_v15, 1  ;;  %v1374_v20 = vadd.f32 %v1373_v16, %v1372_v12 }
 0x48e   :  { %v1354_v21 = vadd.f32 %v1353_v17, %v1352_v13  ;;  %v1369_v22 = vrot.slane %v1368_v18, 1  ;;  %v1496_v13 = vld [vmem:[#allocation8 + $0x10] ss:$8 sm:$0x3] }
 0x48f   :  { %v1360_v23 = vadd.f32 %v1359_v19, %v1358_v15  ;;  %v1375_v24 = vrot.slane %v1374_v20, 1  ;;  %v1503_v17 = vrot.slane %v1496_v13, %v2067_v42 }
 0x490   :  { %v1361_v25 = vmul.f32 0.125, %v1354_v21  ;;  %v1370_v26 = vadd.f32 %v1369_v22, %v1368_v18  ;;  %v1507_v18 = vrot.slane %v1496_v13, %v2069_v43 }
 0x491   :  { %v1362_v27 = vmul.f32 0.125, %v1360_v23  ;;  %v1376_v28 = vadd.f32 %v1375_v24, %v1374_v20  ;;  %v1515_v24 = vld [vmem:[#allocation8 + $0x11] ss:$0 sm:$0xff] }
 0x492   :  { %v1377_v29 = vmul.f32 0.125, %v1370_v26  ;;  %v1379_v30 = vmul.f32 %v1361_v25, %v1361_v25 }
 0x493   :  { %v1378_v31 = vmul.f32 0.125, %v1376_v28  ;;  %v1380_v32 = vmul.f32 %v1362_v27, %v1362_v27 }
 0x494   :  { %v1381_v33 = vsub.f32 %v1377_v29, %v1379_v30 }
 0x495   :  { %v1382_v34 = vsub.f32 %v1378_v31, %v1380_v32 }
 0x496   :  { %v1383_v35 = vmax.f32 %v1381_v33, 0.0 }
 0x497   :  { %v1384_v37 = vmax.f32 %v1382_v34, 0.0 }
 0x498   :  { %v1389_v39 = vadd.f32 1e-05, %v1383_v35 }
 0x499   :  { %v1390_v40 = vadd.f32 1e-05, %v1384_v37 }
 0x49a   :  { %1838 = vrsqrt.f32 %v1389_v39 }
 0x49b   :  { %1840 = vrsqrt.f32 %v1390_v40 }
 0x4a4   :  { %v1839_v44 = vpop.eup %1838 }
 0x4a5   :  { %v1841_v45 = vpop.eup %1840 }
 0x4a6   :  { %v1395_v46 = vcombine.low %v1839_v44, %v1841_v45 }
 0x4a8   :  { %v1402_v47 = vrot.slane %v1395_v46, %v2063_v36 }
 0x4aa   :  { %v1409_v50 = vrot.slane %v1402_v47, %v2063_v36 }
 0x4ac   :  { %v1411_v53 = vmul.f32 %v1409_v50, %v1386_v49 }
 0x4ae   :  { %v1416_v55 = vrot.slane %v1411_v53, %v2067_v42  ;;  %v1420_v38 = vrot.slane %v1411_v53, %v2069_v43 }
 0x4b0   :  { %v1423_v56 = vmul.f32 %v1416_v55, %v1361_v25  ;;  %v1424_v57 = vmul.f32 %v1420_v38, %v1362_v27  ;;  %v1447_v58 = vpack.c.bf16 %v1420_v38, %v1420_v38  ;;  %v1446_v41 = vpack.c.bf16 %v1416_v55, %v1416_v55 }
 0x4b2   :  { %v1427_v59 = vcombine.low %v1423_v56, %v1424_v57  ;;  %v1469_v60 = vpack.i.b16 %v1447_v58, %v1447_v58  ;;  %v1462_v61 = vpack.i.b16 %v1446_v41, %v1446_v41 }
 0x4b4   :  { %v1434_v62 = vrot.slane %v1427_v59, %v2063_v36  ;;  %v1474_v52 = vrot.slane %v1469_v60, %v2067_v42  ;;  %v1467_v3 = vrot.slane %v1462_v61, %v2067_v42 }
 0x4b6   :  { %v1476_v51 = vmul.bf16 %v1474_v52, %v1445_v1  ;;  %v1441_v5 = vrot.slane %v1434_v62, %v2063_v36  ;;  %v1475_v6 = vmul.bf16 %v1467_v3, %v1444_v48 }
 0x4b8   :  { %v1443_v54 = vsub.f32 %v1388_v4, %v1441_v5 }
 0x4ba   :  { %v1452_v7 = vrot.slane %v1443_v54, %v2067_v42  ;;  %v1456_v8 = vrot.slane %v1443_v54, %v2069_v43 }
 0x4bc   :  { %v1459_v63 = vpack.c.bf16 %v1452_v7, %v1452_v7  ;;  %v1460_v9 = vpack.c.bf16 %v1456_v8, %v1456_v8 }
 0x4be   :  { %v1478_v10 = vpack.i.b16 %v1459_v63, %v1459_v63  ;;  %v1485_v11 = vpack.i.b16 %v1460_v9, %v1460_v9 }
 0x4c0   :  { %v1483_v2 = vrot.slane %v1478_v10, %v2067_v42  ;;  %v1490_v12 = vrot.slane %v1485_v11, %v2067_v42 }
 0x4c2   :  { %v1491_v14 = vadd.bf16 %v1483_v2, %v1475_v6  ;;  %v1492_v15 = vadd.bf16 %v1490_v12, %v1476_v51 }
 0x4c4   :  { %v1493_v16 = vmax.bf16 %v1968_v0, %v1491_v14  ;;  %v1494_v36 = vmax.bf16 %v1968_v0, %v1492_v15 }
 0x4c6   :  { %v1497_v19 = vunpack.c.l.bf16 %v1493_v16  ;;  %v1498_v20 = vunpack.c.l.bf16 %v1494_v36 }
 0x4c8   :  { %v1510_v21 = vmul.f32 %v1503_v17, %v1497_v19  ;;  %v1511_v22 = vmul.f32 %v1507_v18, %v1498_v20 }
 0x4ca   :  { %v1512_v23 = vadd.f32 %v1511_v22, %v1510_v21 }
 0x4cc   :  { %1513 = vadd.xlane.f32.xlu0 %v1512_v23 }
 0x559   :  { %v1514_v25 = vpop.xlane.xlu0 %1513 }
 0x55a   :  { %v1516_v26 = vadd.f32 %v1515_v24, %v1514_v25 }
 0x55c   :  { %1517 = vst [vmem:[#allocation10] sm:$0xff] %v1516_v26 }
 0x55d   :  { %1941 = shalt.err (!%p1938_p8)
}
 0x55e   :  { %s1942_s15 = scalar_lea.hbm %s2195_s4, 128 }
 0x55f   :  { %p1943_p9 = scmp.ne.s32.totalorder %s2195_s4, %s1942_s15  ;;  %p1946_p10 = scmp.lt.u32.totalorder %s1942_s15, %s2195_s4 }
 0x561   :  { %p1948_p11 = pnand %p1946_p10, %p1943_p9 }
 0x563   :  { %1951 = shalt.err (!%p1948_p11)
}
 0x564   :  { %1527 = dma.vmem_to_hbm [thread:$0]  %s1525_s12, 128, %s2195_s4, [#allocation4]  }
 0x565   :  { %1958 = dma.done.wait [#allocation4], 128  }
 0x566   :  { %1959 = vsyncadd [#allocation4], 4294967168 }
 0x567   :  { %1531 = vsyncpa [#allocation3], 1 }
 0x568   :  { %1532 = vsyncpa [#allocation6], 1 }
 0x569   :  { %1533 = vsyncpa [#allocation9], 1 }
 0x56a   :  { %1534 = vsyncpa [#allocation4], 1 }

</bundles_post_ra>
